<compile_context>
chip_gen: v6e
topology: v6e:2x2x1
jax: 0.10.0
libtpu: 0.0.40
codegen_flags: <defaults>
</compile_context>

<pallas_src>
import math
from functools import partial

import jax
import jax.numpy as jnp
from jax import lax
from jax.experimental import pallas as pl
from jax.experimental.pallas import tpu as pltpu


# --------------------------------------------------------------------------- #
# Hardware-aware budgets
# --------------------------------------------------------------------------- #
def _vmem_capacity_bytes():
    try:
        info = pltpu.get_tpu_info()
        cap = int(getattr(info, "vmem_capacity_bytes", 0) or 0)
        if cap > 0:
            return cap
    except Exception:
        pass
    return 64 * 1024 * 1024  # conservative fallback: v7x per-TensorCore VMEM


_VMEM_CAP = _vmem_capacity_bytes()
_VMEM_LIMIT_CAP = (_VMEM_CAP * 3) // 4   # <= 48 MiB on v7x, <= 96 MiB on v5e/v6e
_F32_TILE_BUDGET = _VMEM_CAP // 8        # ~8 MiB (v7x) / ~16 MiB (v5e/v6e) of f32 per tile


# --------------------------------------------------------------------------- #
# Layout planning
# --------------------------------------------------------------------------- #
def _plan_layout(total):
    """Lane-dense 2-D view (rows, width), a byte-budget row tile, and the grid size."""
    width = None
    for w in (1024, 512, 256, 128):
        if total % w == 0:
            width = w
            break
    if width is None:
        raise ValueError("total element count must be a multiple of 128")
    rows = total // width

    if rows < 64:
        # Tiny tensor: single full block (block dims == array dims is always legal).
        return rows, width, rows, 1

    # Byte-budget tile: ~_F32_TILE_BUDGET of f32 worth of elements per tile.
    tile_elems = max(32 * 128, _F32_TILE_BUDGET // 4)
    max_rows = max(32, tile_elems // width)

    # Guarantee >= 2 grid steps so the "parallel" axis shards over v7x's 2 TCs
    # and two DMA streams are in flight.
    half_rows = (((rows + 1) // 2) + 31) // 32 * 32
    tile_r = min(max_rows, half_rows, rows)
    tile_r = max(32, (tile_r // 32) * 32)   # keep int8/f32/bf16 tile alignment

    grid = pl.cdiv(rows, tile_r)            # last block padded by Pallas if needed
    return rows, width, tile_r, grid


def _vmem_limit(tile_r, width, io_bytes_per_elem):
    # double-buffered (input + output) tiles, generous headroom, per-chip cap
    needed = 2 * tile_r * width * io_bytes_per_elem
    return int(min(_VMEM_LIMIT_CAP, max(2 * needed, 16 * 1024 * 1024)))


# --------------------------------------------------------------------------- #
# Dequantization kernel (QRecvLayerGPU forward)
# --------------------------------------------------------------------------- #
def _dequant_kernel(s_ref, q_ref, out_ref):
    # s_ref = {step, offset} where offset = step * 2**(bits-1) + min (precomputed).
    step = s_ref[0]
    offset = s_ref[1]
    out_ref[...] = q_ref[...].astype(jnp.float32) * step + offset


def dequantize(q, mn, step, bits, out_dtype=jnp.float32):
    """DequantizationonGPU: (q.float() + 2**(bits-1)) * step + min."""
    if bits > 8:
        # TODO(synk): 8 < bits <= 16 needs the int16 payload + int8 bit-view path.
        raise NotImplementedError("only bits <= 8 supported")

    orig_shape = q.shape
    total = math.prod(orig_shape)
    rows, width, tile_r, grid = _plan_layout(total)
    q2d = q.astype(jnp.int8).reshape(rows, width)

    step_f = jnp.asarray(step, jnp.float32)
    mn_f = jnp.asarray(mn, jnp.float32)
    offset = step_f * (2.0 ** (bits - 1)) + mn_f
    scalars = jnp.stack([step_f, offset])  # single (2,) SMEM operand

    out_bytes = jnp.dtype(out_dtype).itemsize
    out2d = pl.pallas_call(
        _dequant_kernel,
        grid=(grid,),
        in_specs=[
            pl.BlockSpec(memory_space=pltpu.SMEM),            # {step, offset}
            pl.BlockSpec((tile_r, width), lambda i: (i, 0)),  # int8 payload tile
        ],
        out_specs=pl.BlockSpec((tile_r, width), lambda i: (i, 0)),
        out_shape=jax.ShapeDtypeStruct((rows, width), out_dtype),
        compiler_params=pltpu.CompilerParams(
            dimension_semantics=("parallel",),
            vmem_limit_bytes=_vmem_limit(tile_r, width, 1 + out_bytes),
        ),
    )(scalars, q2d)
    return out2d.reshape(orig_shape)


# --------------------------------------------------------------------------- #
# Fused single-pass min/max reduction (for QuantizationGPU)
# --------------------------------------------------------------------------- #
def _minmax_kernel(x_ref, mn_ref, mx_ref, *, rows, tile_r, mask):
    i = pl.program_id(0)

    @pl.when(i == 0)
    def _():
        mn_ref[...] = jnp.full_like(mn_ref, jnp.inf)
        mx_ref[...] = jnp.full_like(mx_ref, -jnp.inf)

    x = x_ref[...].astype(jnp.float32)
    if mask:
        # Last grid block may be padded past `rows`; ignore padded rows.
        row_idx = i * tile_r + lax.broadcasted_iota(jnp.int32, x.shape, 0)
        valid = row_idx < rows
        x_mn = jnp.where(valid, x, jnp.inf)
        x_mx = jnp.where(valid, x, -jnp.inf)
    else:
        x_mn = x_mx = x

    tile_mn = jnp.min(jnp.min(x_mn, axis=1, keepdims=True), axis=0, keepdims=True)
    tile_mx = jnp.max(jnp.max(x_mx, axis=1, keepdims=True), axis=0, keepdims=True)
    mn_ref[...] = jnp.minimum(mn_ref[...], tile_mn)
    mx_ref[...] = jnp.maximum(mx_ref[...], tile_mx)


# --------------------------------------------------------------------------- #
# Quantization kernel (QrecvGPU backward path / QuantizationGPU)
# --------------------------------------------------------------------------- #
def _quant_kernel(s_ref, x_ref, q_ref, *, bits):
    # s_ref = {min, 1/step}. q = round((x - min) * inv_step - 2**(bits-1)), clamped
    # before the int8 cast (cast truncates; value is already rounded + clipped).
    mn = s_ref[0]
    inv_step = s_ref[1]
    half = 2.0 ** (bits - 1)
    xf = x_ref[...].astype(jnp.float32)   # in-kernel widen: free on a mem-bound kernel
    q = jnp.round((xf - mn) * inv_step - half)
    q_ref[...] = jnp.clip(q, -half, half - 1.0).astype(q_ref.dtype)


def quantize(x, bits):
    """QuantizationGPU: returns (q int8, min, step). No identity copy of x."""
    if bits > 8:
        # TODO(synk): 8 < bits <= 16 needs int16 storage + int8 bit-view.
        raise NotImplementedError("only bits <= 8 supported")

    orig_shape = x.shape
    total = math.prod(orig_shape)
    rows, width, tile_r, grid = _plan_layout(total)
    in_bytes = jnp.dtype(x.dtype).itemsize
    x2d = x.reshape(rows, width)  # native dtype -> no extra HBM pass for widening

    # Pass 1: fused min/max (guaranteed single read of x).
    mn2, mx2 = pl.pallas_call(
        partial(_minmax_kernel, rows=rows, tile_r=tile_r, mask=(rows % tile_r != 0)),
        grid=(grid,),
        in_specs=[pl.BlockSpec((tile_r, width), lambda i: (i, 0))],
        out_specs=(
            pl.BlockSpec((1, 1), lambda i: (0, 0)),
            pl.BlockSpec((1, 1), lambda i: (0, 0)),
        ),
        out_shape=(
            jax.ShapeDtypeStruct((1, 1), jnp.float32),
            jax.ShapeDtypeStruct((1, 1), jnp.float32),
        ),
        compiler_params=pltpu.CompilerParams(
            dimension_semantics=("arbitrary",),
            vmem_limit_bytes=_vmem_limit(tile_r, width, in_bytes),
        ),
    )(x2d)
    mn = mn2[0, 0]
    mx = mx2[0, 0]

    step = (mx - mn) / (2.0 ** bits - 1.0)
    # Guard constant tensors (step == 0 would give inf/nan -> undefined int8).
    safe_step = jnp.where(step > 0, step, jnp.float32(1.0))
    inv_step = (1.0 / safe_step).astype(jnp.float32)
    scalars = jnp.stack([mn.astype(jnp.float32), inv_step])  # (2,) SMEM operand

    # Pass 2: elementwise quantize.
    q2d = pl.pallas_call(
        partial(_quant_kernel, bits=bits),
        grid=(grid,),
        in_specs=[
            pl.BlockSpec(memory_space=pltpu.SMEM),            # {min, 1/step}
            pl.BlockSpec((tile_r, width), lambda i: (i, 0)),  # input tile (native dtype)
        ],
        out_specs=pl.BlockSpec((tile_r, width), lambda i: (i, 0)),
        out_shape=jax.ShapeDtypeStruct((rows, width), jnp.int8),
        compiler_params=pltpu.CompilerParams(
            dimension_semantics=("parallel",),
            vmem_limit_bytes=_vmem_limit(tile_r, width, in_bytes + 1),
        ),
    )(scalars, x2d)

    return q2d.reshape(orig_shape), mn, step


# --------------------------------------------------------------------------- #
# Module analogue
# --------------------------------------------------------------------------- #
class QRecvLayerGPU:
    """JAX/Pallas analogue of the PyTorch QRecvLayerGPU module.

    forward: dequantize a received int8 payload with its (min, step) scalars.
    backward path (mirrors QrecvGPU.backward): quantize the gradient, stash the
    payload that would be isend'ed, and pass the gradient through unchanged.
    """

    def __init__(self, bits, recv_rank, rank, pg_group=None):
        self.bits = bits
        self.recv_rank = recv_rank
        self.rank = rank
        self.pg_group = pg_group
        self.min_step = jnp.zeros((2,), jnp.float32)
        self.last_sent = None

    def __call__(self, q_payload, mn, step):
        # TODO(synk): dist.recv of (min, step, payload) from recv_rank has no
        # single-device Pallas equivalent; the received data is passed in here.
        self.min_step = jnp.stack(
            [jnp.asarray(mn, jnp.float32), jnp.asarray(step, jnp.float32)]
        )
        return dequantize(q_payload, mn, step, self.bits)

    def backward(self, grad_output):
        q, mn, step = quantize(grad_output, self.bits)
        # TODO(synk): dist.isend of (min, step, q) to recv_rank is distributed
        # plumbing with no single-device equivalent; payload is stashed instead.
        self.last_sent = (q, mn, step)
        return grad_output  # gradient passes through unchanged (no copy made)


# --------------------------------------------------------------------------- #
# Pure-JAX references
# --------------------------------------------------------------------------- #
def _reference_quantize(x, bits):
    xf = x.astype(jnp.float32)
    mn = jnp.min(xf)
    mx = jnp.max(xf)
    step = (mx - mn) / (2.0 ** bits - 1.0)
    q = jnp.round((xf - mn) / step - 2.0 ** (bits - 1))
    q = jnp.clip(q, -(2.0 ** (bits - 1)), 2.0 ** (bits - 1) - 1.0).astype(jnp.int8)
    return q, mn, step


def _reference_dequantize(q, mn, step, bits):
    return (q.astype(jnp.float32) + 2.0 ** (bits - 1)) * step + mn


if __name__ == "__main__":
    key = jax.random.PRNGKey(0)
    bits = 8
    shape = (2, 4, 16, 16)  # NCHW, as in the PyTorch pipeline
    k1, k2, k3, k4 = jax.random.split(key, 4)
    x = jax.random.normal(k1, shape, dtype=jnp.float32)

    # Payload the sending rank would have produced (simulated with pure JAX).
    q_in, mn_in, step_in = _reference_quantize(x, bits)

    layer = QRecvLayerGPU(bits=bits, recv_rank=1, rank=0, pg_group=None)

    # --- forward: dequantization kernel ---
    out = layer(q_in, mn_in, step_in)
    jax.block_until_ready(out)
    ref_out = _reference_dequantize(q_in, mn_in, step_in, bits)
    assert out.shape == shape and out.dtype == jnp.float32
    assert jnp.allclose(out, ref_out, rtol=1e-5, atol=1e-5), "dequant mismatch"

    # --- backward path: fused min/max + quantization kernels (f32 grads) ---
    g = jax.random.normal(k2, shape, dtype=jnp.float32)
    g_out = layer.backward(g)
    q, mn, step = layer.last_sent
    jax.block_until_ready((g_out, q, mn, step))
    rq, rmn, rstep = _reference_quantize(g, bits)
    assert jnp.allclose(g_out, g), "gradient pass-through mismatch"
    assert jnp.allclose(mn, rmn, rtol=1e-6, atol=1e-6), "min mismatch"
    assert jnp.allclose(step, rstep, rtol=1e-6, atol=1e-6), "step mismatch"
    # Allow off-by-one on round-to-nearest ties / reciprocal reassociation.
    assert int(jnp.max(jnp.abs(q.astype(jnp.int32) - rq.astype(jnp.int32)))) <= 1, \
        "quantized payload mismatch"

    # --- bf16 gradients stream straight into the kernels (no wrapper f32 pass) ---
    gb = jax.random.normal(k3, shape, dtype=jnp.bfloat16)
    qb, mnb, stepb = quantize(gb, bits)
    jax.block_until_ready(qb)
    rqb, rmnb, rstepb = _reference_quantize(gb, bits)
    assert jnp.allclose(mnb, rmnb, rtol=1e-6, atol=1e-6), "bf16 min mismatch"
    assert jnp.allclose(stepb, rstepb, rtol=1e-6, atol=1e-6), "bf16 step mismatch"
    assert int(jnp.max(jnp.abs(qb.astype(jnp.int32) - rqb.astype(jnp.int32)))) <= 1, \
        "bf16 quantized payload mismatch"

    # --- awkward row count: multi-step grid + padded/masked last block ---
    shape2 = (2, 3, 40, 40)  # 9600 elems -> (75, 128) view, tile_r=64, grid=2
    x2 = jax.random.normal(k4, shape2, dtype=jnp.float32)
    q2r, mn2r, step2r = _reference_quantize(x2, bits)
    out2 = dequantize(q2r, mn2r, step2r, bits)
    jax.block_until_ready(out2)
    ref2 = _reference_dequantize(q2r, mn2r, step2r, bits)
    assert jnp.allclose(out2, ref2, rtol=1e-5, atol=1e-5), "awkward dequant mismatch"
    qq2, qmn2, qstep2 = quantize(x2, bits)
    jax.block_until_ready(qq2)
    assert jnp.allclose(qmn2, mn2r, rtol=1e-6, atol=1e-6), "awkward min mismatch"
    assert jnp.allclose(qstep2, step2r, rtol=1e-6, atol=1e-6), "awkward step mismatch"
    assert int(jnp.max(jnp.abs(qq2.astype(jnp.int32) - q2r.astype(jnp.int32)))) <= 1, \
        "awkward quantized payload mismatch"

    # --- constant tensor: step == 0 must not produce NaN/Inf ---
    # Note: with step==0 the transmitted q is all -128 (safe_step=1); dequant still
    # reconstructs the constant value mn exactly.
    c = jnp.ones(shape, jnp.float32)
    qc, mnc, stepc = quantize(c, bits)
    jax.block_until_ready(qc)
    assert bool(jnp.isfinite(mnc)) and bool(jnp.isfinite(stepc)), "step==0 guard failed"

    print("KERNEL_OK")
</pallas_src>

<mosaic_0001>
module attributes {stable_mosaic.version = 11 : i64} {
  func.func @_dequant_kernel(%arg0: i32, %arg1: memref<2xf32, #tpu.memory_space<smem>>, %arg2: memref<2x1024xi8, #tpu.memory_space<vmem>>, %arg3: memref<2x1024xf32, #tpu.memory_space<vmem>>) attributes {dimension_semantics = [#tpu.dimension_semantics<parallel>], iteration_bounds = array<i64: 1>, scalar_prefetch = 0 : i64, scratch_operands = 0 : i64, tpu.core_type = #tpu.core_type<tc>, window_params = [{transform_indices = @transform_0, window_bounds = array<i64: 2>}, {transform_indices = @transform_1, window_bounds = array<i64: 2, 1024>}, {transform_indices = @transform_2, window_bounds = array<i64: 2, 1024>}]} {
    %c0 = arith.constant 0 : index
    %0 = memref.load %arg1[%c0] : memref<2xf32, #tpu.memory_space<smem>>
    %c1 = arith.constant 1 : index
    %1 = memref.load %arg1[%c1] : memref<2xf32, #tpu.memory_space<smem>>
    %c0_0 = arith.constant 0 : index
    %c0_1 = arith.constant 0 : index
    %2 = vector.load %arg2[%c0_0, %c0_1] : memref<2x1024xi8, #tpu.memory_space<vmem>>, vector<2x1024xi8>
    %3 = arith.sitofp %2 : vector<2x1024xi8> to vector<2x1024xf32>
    %4 = vector.broadcast %0 : f32 to vector<2x1024xf32>
    %5 = arith.mulf %3, %4 : vector<2x1024xf32>
    %6 = vector.broadcast %1 : f32 to vector<2x1024xf32>
    %7 = arith.addf %5, %6 : vector<2x1024xf32>
    %c0_2 = arith.constant 0 : index
    %c0_3 = arith.constant 0 : index
    %8 = vector.load %arg3[%c0_2, %c0_3] : memref<2x1024xf32, #tpu.memory_space<vmem>>, vector<2x1024xf32>
    tpu.vector_store %arg3[%c0_2, %c0_3], %7 {strides = array<i32>} : memref<2x1024xf32, #tpu.memory_space<vmem>>, vector<2x1024xf32>,
    return
  }
  func.func @transform_0(%arg0: i32) -> i32 {
    %c0_i32 = arith.constant 0 : i32
    %c0_i32_0 = arith.constant 0 : i32
    return %c0_i32 : i32
  }
  func.func @transform_1(%arg0: i32) -> (i32, i32) {
    %c0_i32 = arith.constant 0 : i32
    %c0_i32_0 = arith.constant 0 : i32
    return %arg0, %c0_i32 : i32, i32
  }
  func.func @transform_2(%arg0: i32) -> (i32, i32) {
    %c0_i32 = arith.constant 0 : i32
    %c0_i32_0 = arith.constant 0 : i32
    return %arg0, %c0_i32 : i32, i32
  }
}

</mosaic_0001>

<bundles_post_ra>
// kernel: tpu_custom_call.1
= control target key start
LH: loop header
LB: loop body
LE: loop exit
PB: predicated region body
PF: predicated region fallthrough
CT: control target
= control target key end

     0   :  { %7 = vsyncpa [#allocation5], 0  ;;  %s197_s0 = inlined_call_operand.hbm [shape: f32[2], index: 0, kind: input, shape index: {}]   ;;  %s198_s1 = inlined_call_operand.hbm [shape: s8[2,1024], index: 1, kind: input, shape index: {}]   ;;  %s199_s2 = inlined_call_operand.hbm [shape: f32[2,1024], index: 2, kind: output, shape index: {}]  }
   0x1   :  { %8 = vsyncpa [#allocation3], 0 }
   0x2   :  { %9 = vsyncpa [#allocation4], 0  ;;  %s169_s9 = smov [#allocation2]   ;;  %s170_s12 = smov [#allocation6]  }
   0x3   :  { %17 = dma.hbm_to_smem %s197_s0, 16, %s169_s9, [#allocation5]  }
   0x4   :  { %s24_s13 = sshll.u32 %s170_s12, 4  ;;  %s25_s13 = int_to_ptr.vmem [resolvable:$true] %s24_s13 }
   0x5   :  { %s131_s14 = scalar_lea.vmem %s25_s13, 128  ;;  %p136_p1 = scmp.lt.s32.totalorder %s25_s13, %s25_s13 }
   0x6   :  { %p132_p0 = scmp.ne.s32.totalorder %s25_s13, %s131_s14  ;;  %p137_p2 = scmp.lt.s32.totalorder %s131_s14, %s131_s14 }
   0x8   :  { %p138_p3 = por %p137_p2, %p136_p1 }
   0xa   :  { %p139_p4 = pnand %p138_p3, %p132_p0 }
   0xc   :  { %142 = shalt.err (!%p139_p4)
}
   0xd   :  { %27 = dma.hbm_to_vmem [thread:$0]  %s198_s1, 128, %s25_s13, [#allocation3]  }
   0xe   :  { %163 = dma.done.wait [#allocation5], 16  }
   0xf   :  { %164 = vsyncadd [#allocation5], 4294967280 }
  0x10   :  { %165 = dma.done.wait [#allocation3], 128  }
  0x11   :  { %166 = vsyncadd [#allocation3], 4294967168 }
  0x12   :  { %34 = sfence }
  0x13   :  { %s35_s0 = sld [smem:[#allocation2]]  ;;  %v37_v0 = vld [vmem:[#allocation6] sm:$0xff]  ;;  %v63_v1 = vlaneseq  ;;  %v171_v4 = vmov 1983009808   ;;  %s172_s1 = smov [#allocation7]  }
  0x14   :  { %s110_s17 = sld [smem:[#allocation2 + $0x1]]  ;;  %v38_v2 = vunpack.c.0.s8 %v37_v0  ;;  %v39_v3 = vunpack.c.1.s8 %v37_v0  ;;  %v61_v5 = vunpack.c.l.s4 %v171_v4  ;;  %v40_v6 = vunpack.c.2.s8 %v37_v0  ;;  %s100_s18 = sshll.u32 %s172_s1, 4  ;;  %s101_s18 = int_to_ptr.vmem [resolvable:$true] %s100_s18 }
  0x15   :  { %v64_v7 = vshrl.u32 %v63_v1, 7  ;;  %v41_v8 = vunpack.c.3.s8 %v37_v0  ;;  %s143_s19 = scalar_lea.vmem %s101_s18, 256  ;;  %p148_p6 = scmp.lt.s32.totalorder %s101_s18, %s101_s18 }
  0x16   :  { %v42_v9 = vcvt.s32.f32 %v38_v2  ;;  %v43_v10 = vcvt.s32.f32 %v39_v3  ;;  %v62_v11 = vunpack.c.0.s8 %v61_v5  ;;  %v44_v12 = vcvt.s32.f32 %v40_v6  ;;  %p144_p5 = scmp.ne.s32.totalorder %s101_s18, %s143_s19  ;;  %p149_p7 = scmp.lt.s32.totalorder %s143_s19, %s143_s19 }
  0x17   :  { %v45_v13 = vcvt.s32.f32 %v41_v8 }
  0x18   :  { %v65_v15 = vsub.s32 %v62_v11, %v64_v7  ;;  %p150_p8 = por %p149_p7, %p148_p6 }
  0x19   :  { %v46_v14 = vstv %s35_s0 }
  0x1a   :  { %v47_v16 = vmul.f32 %v46_v14, %v42_v9  ;;  %v48_v17 = vmul.f32 %v46_v14, %v43_v10  ;;  %v51_v18 = vstv %s110_s17  ;;  %v49_v19 = vmul.f32 %v46_v14, %v44_v12  ;;  %p151_p9 = pnand %p150_p8, %p144_p5 }
  0x1b   :  { %v50_v20 = vmul.f32 %v46_v14, %v45_v13 }
  0x1c   :  { %v52_v21 = vadd.f32 %v51_v18, %v47_v16  ;;  %v53_v22 = vadd.f32 %v51_v18, %v48_v17  ;;  %v54_v23 = vadd.f32 %v51_v18, %v49_v19 }
  0x1d   :  { %v55_v24 = vadd.f32 %v51_v18, %v50_v20 }
  0x1e   :  { %v66_v25 = vrot.slane %v52_v21, %v65_v15  ;;  %v73_v26 = vrot.slane %v53_v22, %v65_v15  ;;  %v81_v27 = vrot.slane %v54_v23, %v65_v15 }
  0x1f   :  { %v88_v28 = vrot.slane %v55_v24, %v65_v15 }
  0x20   :  { %v74_v29 = vcombine.low %v66_v25, %v73_v26 }
  0x21   :  { %v89_v30 = vcombine.low %v81_v27, %v88_v28 }
  0x22   :  { %92 = vst [vmem:[#allocation7] sm:$0xff] %v74_v29 }
  0x23   :  { %93 = vst [vmem:[#allocation7 + $0x8] sm:$0xff] %v89_v30 }
  0x24   :  { %154 = shalt.err (!%p151_p9)
}
  0x25   :  { %103 = dma.vmem_to_hbm [thread:$0]  %s101_s18, 256, %s199_s2, [#allocation4]  }
  0x26   :  { %167 = dma.done.wait [#allocation4], 256  }
  0x27   :  { %168 = vsyncadd [#allocation4], 4294967040 }
  0x28   :  { %107 = vsyncpa [#allocation3], 1 }
  0x29   :  { %108 = vsyncpa [#allocation4], 1 }
  0x2a   :  { %109 = vsyncpa [#allocation5], 1 }

</bundles_post_ra>
